<compile_context>
chip_gen: v5e
topology: v5e:2x2
jax: 0.10.0
libtpu: 0.0.40
codegen_flags: <defaults>
</compile_context>

<pallas_src>
import functools

import jax
import jax.numpy as jnp
from jax.experimental import pallas as pl
from jax.experimental.pallas import tpu as pltpu


def _round_up(x: int, m: int) -> int:
    return ((x + m - 1) // m) * m


def _modulation_kernel(x_ref, w_ref, b_ref, o_ref):
    # x_ref: (tm, Df) bf16   w_ref: (Df, Nf) bf16   b_ref: (1, Nf) f32
    # o_ref: (tm, Nf) f32
    y = jnp.dot(x_ref[...], w_ref[...], preferred_element_type=jnp.float32)
    y = y + b_ref[...]                      # bias broadcast over rows (f32)
    o_ref[...] = jax.nn.sigmoid(y).astype(o_ref.dtype)


@functools.partial(jax.jit, static_argnames=("nheads", "channels", "row_tile"))
def modulation_generator_forward(task_emb, weight_t, bias, *, nheads, channels,
                                 row_tile=512):
    """task_emb: (T, B, task_dim) f32
       weight_t: (task_dim, nheads*channels) f32 (transpose of torch Linear weight)
       bias:     (nheads*channels,) f32
       returns:  (T, B, nheads, channels) f32, sigmoid-modulated."""
    T, B, D = task_emb.shape
    N = nheads * channels
    M = T * B
    compute_dtype = jnp.bfloat16

    # ---- lane-dense fold factor: pack F rows per lane row so N*F is 128-dense.
    if N < 128 and 128 % N == 0:
        F = 128 // N
    else:
        F = 1
    Df, Nf = F * D, F * N

    # ---- pad folded row count to a whole number of row tiles (tile % 8 == 0).
    mf_raw = pl.cdiv(M, F)
    tm = min(row_tile, _round_up(mf_raw, 8))
    Mf = _round_up(mf_raw, tm)
    M_pad = Mf * F

    # ---- build kernel operands (cheap parameter prep, done under jit).
    x2d = task_emb.reshape(M, D).astype(compute_dtype)
    if M_pad > M:
        x2d = jnp.pad(x2d, ((0, M_pad - M), (0, 0)))
    x_fold = x2d.reshape(Mf, Df)

    if F > 1:
        # Block-diagonal weight: out_fold[i, j*N:(j+1)*N] = x[i*F + j] @ W
        w_bd = jnp.kron(jnp.eye(F, dtype=weight_t.dtype), weight_t)   # (Df, Nf)
        b_f = jnp.tile(bias, F)
    else:
        w_bd = weight_t
        b_f = bias
    w_bd = w_bd.astype(compute_dtype)
    b2d = b_f.astype(jnp.float32).reshape(1, Nf)

    grid = (Mf // tm,)
    out_fold = pl.pallas_call(
        _modulation_kernel,
        out_shape=jax.ShapeDtypeStruct((Mf, Nf), jnp.float32),
        grid_spec=pltpu.PrefetchScalarGridSpec(
            num_scalar_prefetch=0,
            grid=grid,
            in_specs=[
                pl.BlockSpec((tm, Df), lambda i: (i, 0)),   # streamed x tiles
                pl.BlockSpec((Df, Nf), lambda i: (0, 0)),   # resident weight
                pl.BlockSpec((1, Nf), lambda i: (0, 0)),    # resident bias
            ],
            out_specs=pl.BlockSpec((tm, Nf), lambda i: (i, 0)),
        ),
        compiler_params=pltpu.CompilerParams(
            # Row tiles are independent -> shard across v7x's 2 TensorCores.
            dimension_semantics=("parallel",),
        ),
    )(x_fold, w_bd, b2d)

    # Unfold, drop padding, and apply the (T, B, nheads, channels) view.
    out = out_fold.reshape(M_pad, N)[:M]
    return out.reshape(T, B, nheads, channels)


if __name__ == "__main__":
    # Module hyper-parameters (small, consistent with the PyTorch __init__):
    #   task_dim=32, conv_feature_dims=(channels=8, H=16, W=16), nheads=4
    task_dim = 32
    channels, height, width = 8, 16, 16
    nheads = 4
    T, Bsz = 2, 4

    key = jax.random.PRNGKey(0)
    k_x, k_w, k_b = jax.random.split(key, 3)

    # Deterministic synthetic parameters. torch Linear weight is (out, in);
    # we store the transpose (in, out).
    weight = jax.random.normal(k_w, (nheads * channels, task_dim), jnp.float32) * 0.1
    bias = jax.random.normal(k_b, (nheads * channels,), jnp.float32) * 0.1
    weight_t = weight.T

    # Example input: task_emb of shape (T, B, task_dim). goal_state is unused
    # when use_history=False (matches the reference forward).
    # TODO(synk): use_history=True branch needs a recurrent goal-tracking cell;
    # the reference itself raises NotImplemented, so it is not translated.
    task_emb = jax.random.normal(k_x, (T, Bsz, task_dim), jnp.float32)

    out = modulation_generator_forward(task_emb, weight_t, bias,
                                       nheads=nheads, channels=channels)
    out = jax.block_until_ready(out)

    # Sanity check against pure-JAX f32 reference (bf16 streaming operands ->
    # loosened tolerance; post-sigmoid drift is small).
    ref = jax.nn.sigmoid(
        jnp.einsum("tbd,dn->tbn", task_emb, weight_t) + bias
    ).reshape(T, Bsz, nheads, channels)
    assert out.shape == (T, Bsz, nheads, channels)
    assert jnp.allclose(out, ref, atol=2e-2, rtol=2e-2), float(
        jnp.max(jnp.abs(out - ref)))

    print("KERNEL_OK")
</pallas_src>

<mosaic_0001>
module attributes {stable_mosaic.version = 11 : i64} {
  func.func @_modulation_kernel(%arg0: i32, %arg1: memref<8x128xbf16, #tpu.memory_space<vmem>>, %arg2: memref<128x128xbf16, #tpu.memory_space<vmem>>, %arg3: memref<1x128xf32, #tpu.memory_space<vmem>>, %arg4: memref<8x128xf32, #tpu.memory_space<vmem>>) attributes {dimension_semantics = [#tpu.dimension_semantics<parallel>], iteration_bounds = array<i64: 1>, scalar_prefetch = 0 : i64, scratch_operands = 0 : i64, tpu.core_type = #tpu.core_type<tc>, window_params = [{transform_indices = @transform_0, window_bounds = array<i64: 8, 128>}, {pipeline_mode = #tpu.pipeline_mode<synchronous>, transform_indices = @transform_1, window_bounds = array<i64: 128, 128>}, {pipeline_mode = #tpu.pipeline_mode<synchronous>, transform_indices = @transform_2, window_bounds = array<i64: 1, 128>}, {transform_indices = @transform_3, window_bounds = array<i64: 8, 128>}]} {
    %c0 = arith.constant 0 : index
    %c0_0 = arith.constant 0 : index
    %0 = vector.load %arg1[%c0, %c0_0] : memref<8x128xbf16, #tpu.memory_space<vmem>>, vector<8x128xbf16>
    %c0_1 = arith.constant 0 : index
    %c0_2 = arith.constant 0 : index
    %1 = vector.load %arg2[%c0_1, %c0_2] : memref<128x128xbf16, #tpu.memory_space<vmem>>, vector<128x128xbf16>
    %cst = arith.constant dense<0.000000e+00> : vector<8x128xf32>
    %2 = tpu.matmul %0, %1, %cst {dimension_numbers = #tpu.dot_dimension_numbers<[1], [0], [0], [1], [0, 0, 1, 1], [], []>} : vector<8x128xbf16>, vector<128x128xbf16>, vector<8x128xf32> -> vector<8x128xf32>
    %c0_3 = arith.constant 0 : index
    %c0_4 = arith.constant 0 : index
    %3 = vector.load %arg3[%c0_3, %c0_4] : memref<1x128xf32, #tpu.memory_space<vmem>>, vector<1x128xf32>
    %4 = vector.broadcast %3 : vector<1x128xf32> to vector<8x128xf32>
    %5 = arith.addf %2, %4 : vector<8x128xf32>
    %6 = arith.negf %5 : vector<8x128xf32>
    %7 = math.exp %6 : vector<8x128xf32>
    %cst_5 = arith.constant 1.000000e+00 : f32
    %8 = vector.broadcast %cst_5 : f32 to vector<8x128xf32>
    %9 = arith.addf %8, %7 : vector<8x128xf32>
    %10 = arith.divf %8, %9 : vector<8x128xf32>
    %c0_6 = arith.constant 0 : index
    %c0_7 = arith.constant 0 : index
    %11 = vector.load %arg4[%c0_6, %c0_7] : memref<8x128xf32, #tpu.memory_space<vmem>>, vector<8x128xf32>
    tpu.vector_store %arg4[%c0_6, %c0_7], %10 {strides = array<i32>} : memref<8x128xf32, #tpu.memory_space<vmem>>, vector<8x128xf32>,
    return
  }
  func.func @transform_0(%arg0: i32) -> (i32, i32) {
    %c0_i32 = arith.constant 0 : i32
    %c0_i32_0 = arith.constant 0 : i32
    return %arg0, %c0_i32 : i32, i32
  }
  func.func @transform_1(%arg0: i32) -> (i32, i32) {
    %c0_i32 = arith.constant 0 : i32
    %c0_i32_0 = arith.constant 0 : i32
    %c0_i32_1 = arith.constant 0 : i32
    return %c0_i32, %c0_i32_0 : i32, i32
  }
  func.func @transform_2(%arg0: i32) -> (i32, i32) {
    %c0_i32 = arith.constant 0 : i32
    %c0_i32_0 = arith.constant 0 : i32
    %c0_i32_1 = arith.constant 0 : i32
    return %c0_i32, %c0_i32_0 : i32, i32
  }
  func.func @transform_3(%arg0: i32) -> (i32, i32) {
    %c0_i32 = arith.constant 0 : i32
    %c0_i32_0 = arith.constant 0 : i32
    return %arg0, %c0_i32 : i32, i32
  }
}

</mosaic_0001>

<bundles_post_ra>
// kernel: tile.8
= control target key start
LH: loop header
LB: loop body
LE: loop exit
PB: predicated region body
PF: predicated region fallthrough
CT: control target
= control target key end

     0   :  { %s22_s0 = inlined_call_operand.vmem [shape: f32[32], index: 0, kind: input, shape index: {}]   ;;  %s23_s1 = inlined_call_operand.vmem [shape: f32[4,32], index: 1, kind: output, shape index: {}]  }
   0x1   :  { %v4_v0 = vld [vmem:[%s22_s0] ss:$0 sm:$0xff] }
   0x2   :  { %5 = vst [vmem:[%s23_s1] sm:$0xf] %v4_v0 }

// kernel: tile.9
= control target key start
LH: loop header
LB: loop body
LE: loop exit
PB: predicated region body
PF: predicated region fallthrough
CT: control target
= control target key end

     0   :  { %s37_s8 = smov 32   ;;  %s38_s9 = smov 64   ;;  %vm7_vm0 = vcmask 261120   ;;  %vm13_vm1 = vcmask 1048320   ;;  %vm19_vm2 = vcmask 785920   ;;  %vm25_vm3 = vcmask 523520   ;;  %s55_s0 = inlined_call_operand.vmem [shape: f32[4,32], index: 0, kind: input, shape index: {}]   ;;  %s56_s1 = inlined_call_operand.vmem [shape: f32[1,128], index: 1, kind: output, shape index: {}]  }
   0x1   :  { %v4_v0 = vld [vmem:[%s55_s0] sm:$0xf]  ;;  %s36_s0 = smov 96  }
   0x2   :  { %5 = vst [vmem:[#allocation1] sm:$0xf] %v4_v0 }
   0x9   :  { %v10_v1 = vld [vmem:[#allocation1 + $0x3] sm:$0x1]   ;;  %v22_v2 = vld [vmem:[#allocation1 + $0x1] sm:$0x1]   ;;  %v16_v3 = vld [vmem:[#allocation1 + $0x2] sm:$0x1]  }
   0xa   :  { %11 = vrot.lane.b32.xlu0 %v10_v1, %s36_s0  ;;  %23 = vrot.lane.b32.xlu1 %v22_v2, %s37_s8  ;;  %v6_v4 = vld [vmem:[#allocation1] sm:$0x1]  }
   0xb   :  { %8 = vst.msk [vmem:[#allocation0] sm:$0x1] %vm7_vm0, %v6_v4  }
  0x12   :  { %17 = vrot.lane.b32.xlu0 %v16_v3, %s38_s9 }
  0x7c   :  { %v12_v5 = vpop.permute.xlu0 %11   ;;  %v24_v6 = vpop.permute.xlu1 %23  }
  0x7d   :  { %14 = vst.msk [vmem:[#allocation0] sm:$0x1] %vm13_vm1, %v12_v5  }
  0x84   :  { %v18_v7 = vpop.permute.xlu0 %17  }
  0x85   :  { %20 = vst.msk [vmem:[#allocation0] sm:$0x1] %vm19_vm2, %v18_v7  }
  0x86   :  { %26 = vst.msk [vmem:[#allocation0] sm:$0x1] %vm25_vm3, %v24_v6  }
  0x8d   :  { %v29_v8 = vld [vmem:[#allocation0] sm:$0x1] }
  0x8e   :  { %32 = vst [vmem:[%s56_s1] sm:$0x1] %v29_v8 }

// kernel: modulation_generator_forward.1
= control target key start
LH: loop header
LB: loop body
LE: loop exit
PB: predicated region body
PF: predicated region fallthrough
CT: control target
= control target key end

     0   :  { %s219_s1 = inlined_call_operand.vmem [shape: bf16[128,128], index: 1, kind: input, shape index: {}]   ;;  %s220_s2 = inlined_call_operand.vmem [shape: f32[1,128], index: 2, kind: input, shape index: {}]   ;;  %s221_s0 = inlined_call_operand.vmem [shape: bf16[8,128], index: 0, kind: input, shape index: {}]   ;;  %s222_s3 = inlined_call_operand.vmem [shape: f32[8,128], index: 3, kind: output, shape index: {}]  }
   0x1   :  { %v160_v0 = vld [vmem:[%s219_s1 + $0x38] sm:$0xff]  ;;  %v159_v1 = vld [vmem:[%s219_s1 + $0x30] sm:$0xff]  ;;  %v158_v2 = vld [vmem:[%s219_s1 + $0x28] sm:$0xff] }
   0x2   :  { %83 = vmatpush.bf16.msra.mxu0 %v160_v0  ;;  %v157_v3 = vld [vmem:[%s219_s1 + $0x20] sm:$0xff]  ;;  %v156_v4 = vld [vmem:[%s219_s1 + $0x18] sm:$0xff]  ;;  %v155_v5 = vld [vmem:[%s219_s1 + $0x10] sm:$0xff] }
   0x3   :  { %v154_v6 = vld [vmem:[%s219_s1 + $0x8] sm:$0xff]  ;;  %v153_v7 = vld [vmem:[%s219_s1] sm:$0xff] }
   0x4   :  { %v14_v8 = vld [vmem:[%s221_s0] sm:$0xf] }
   0x5   :  { %v161_v9 = vld [vmem:[%s220_s2] ss:$0 sm:$0xff] }
   0x6   :  { %84 = vmatpush.bf16.msra.mxu0 %v159_v1 }
   0xa   :  { %85 = vmatpush.bf16.msra.mxu0 %v158_v2 }
   0xe   :  { %86 = vmatpush.bf16.msra.mxu0 %v157_v3 }
  0x12   :  { %87 = vmatpush.bf16.msra.mxu0 %v156_v4 }
  0x16   :  { %88 = vmatpush.bf16.msra.mxu0 %v155_v5 }
  0x1a   :  { %89 = vmatpush.bf16.msra.mxu0 %v154_v6 }
  0x1e   :  { %90 = vmatpush.bf16.msra.mxu0 %v153_v7 }
  0x21   :  { %91 = vmatmul.bf16.vlgmr.msra.gmra.mxu0 %v14_v8 }
  0x9e   :  { %v92_v10 = vpop.f32.mrf.mxu0 }
  0x9f   :  { %v93_v11 = vadd.f32 %v161_v9, %v92_v10 }
  0xa1   :  { %v152_v12 = vmul.f32 -1.442695, %v93_v11 }
  0xa3   :  { %162 = vpow2.f32 %v152_v12 }
  0xa6   :  { %v94_v13 = vpop.f32.mrf.mxu0 }
  0xa9   :  { %v163_v14 = vpop.eup %162 }
  0xaa   :  { %v99_v15 = vadd.f32 1.0, %v163_v14 }
  0xac   :  { %164 = vrcp.f32 %v99_v15  ;;  %v111_v19 = vand.u32 2147483648, %v99_v15  ;;  %v109_v21 = vand.u32 2147483647, %v99_v15  ;;  %vm105_vm1 = vweird.f32 %v99_v15 }
  0xae   :  { %v112_v23 = vor.u32 1.1754944e-38, %v111_v19  ;;  %vm110_vm3 = vcmp.eq.f32.partialorder %v109_v21, 8.507059e+37 }
  0xb2   :  { %v165_v16 = vpop.eup %164 }
  0xb3   :  { %v101_v17 = vmul.f32 %v165_v16, %v99_v15  ;;  %vm106_vm0 = vweird.f32 %v165_v16 }
  0xb4   :  { %vm107_vm2 = vmor %vm105_vm1, %vm106_vm0 }
  0xb5   :  { %v102_v18 = vsub.f32 1.0, %v101_v17 }
  0xb7   :  { %v103_v20 = vmul.f32 %v165_v16, %v102_v18 }
  0xb9   :  { %v104_v22 = vadd.f32 %v165_v16, %v103_v20 }
  0xbb   :  { %v108_v24 = vsel %vm107_vm2, %v165_v16, %v104_v22 }
  0xbc   :  { %v113_v25 = vsel %vm110_vm3, %v112_v23, %v108_v24 }
  0xbd   :  { %115 = vst [vmem:[%s222_s3] sm:$0xff] %v113_v25 }

</bundles_post_ra>
